<compile_context>
chip_gen: v7x
topology: tpu7x:2x2x1
jax: 0.10.0
libtpu: 0.0.40
codegen_flags: <defaults>
</compile_context>

<pallas_src>
import functools
import math

import jax
import jax.numpy as jnp
from jax import lax
from jax.experimental import pallas as pl
from jax.experimental.pallas import tpu as pltpu

_EPS2 = 1e-24  # (1e-12)**2 -> rsqrt(max(sumsq, eps^2)) == 1/max(||x||, eps) (torch F.normalize)


def _cosface_kernel(feat_ref, wt_ref, labels_ref, loss_ref,
                    m_acc, l_acc, t_acc, fn_ref,
                    *, s, m, tc, c_valid, c_pad, mm_dtype):
    """One (TB rows) x (TC classes) tile of the CosFace cross-entropy.

    feat_ref:   (TB, D)  f32        raw (zero-padded) features
    wt_ref:     (D, TC)  bf16/f32   pre-normalized weight, lane-dense in C
    labels_ref: (TB, 1)  i32
    loss_ref:   (TB, 1)  f32        per-example loss (written on last C-tile)
    m/l/t_acc:  (TB, 1)  f32 scratch  -- online-LSE state across C-tiles
    fn_ref:     (TB, D)  mm_dtype scratch -- cached s * normalized features
    """
    c = pl.program_id(1)

    @pl.when(c == 0)
    def _init():
        # Online-LSE state.  The first-tile update below relies on IEEE
        # semantics: exp(-inf - finite) == 0, so l_acc gets no spurious mass.
        m_acc[...] = jnp.full_like(m_acc, -jnp.inf)
        l_acc[...] = jnp.zeros_like(l_acc)
        t_acc[...] = jnp.zeros_like(t_acc)
        # Hoisted per-batch-tile feature work: L2-normalize rows once (EUP
        # rsqrt), fold in the scale s, cast to the MXU operand dtype, cache.
        f = feat_ref[...].astype(jnp.float32)
        inv = lax.rsqrt(jnp.maximum(jnp.sum(f * f, axis=1, keepdims=True), _EPS2))
        fn_ref[...] = (f * (inv * s)).astype(mm_dtype)

    # (TB, D) @ (D, TC) on the MXU, f32 accumulation; s is already folded into
    # the cached features, so this is s * cosine directly.
    s_cos = jnp.dot(fn_ref[...], wt_ref[...], preferred_element_type=jnp.float32)

    # Margin via a boolean mask against the tile-relative label (no float
    # one-hot, no global-iota add): saves VALU ops on the big (TB, TC) tile.
    col = lax.broadcasted_iota(jnp.int32, s_cos.shape, 1)          # (TB, TC)
    rel = labels_ref[...] - c * tc                                  # (TB, 1)
    is_tgt = col == rel
    logits = s_cos - jnp.where(is_tgt, jnp.float32(s * m), jnp.float32(0.0))
    if c_pad != c_valid:
        # Mask zero-padded classes out of the LSE (only the last tile has any;
        # the compare-against-scalar is cheap enough to run unconditionally).
        logits = jnp.where(col < (c_valid - c * tc), logits, -jnp.inf)

    # Online logsumexp update + target-logit accumulation.
    tile_max = jnp.max(logits, axis=1, keepdims=True)               # (TB, 1)
    m_new = jnp.maximum(m_acc[...], tile_max)
    l_acc[...] = (jnp.exp(m_acc[...] - m_new) * l_acc[...]
                  + jnp.sum(jnp.exp(logits - m_new), axis=1, keepdims=True))
    t_acc[...] = t_acc[...] + jnp.sum(jnp.where(is_tgt, logits, jnp.float32(0.0)),
                                      axis=1, keepdims=True)
    m_acc[...] = m_new

    @pl.when(c == pl.num_programs(1) - 1)
    def _finalize():
        # TODO(synk): emit a lane-dense (1, TB) loss block instead of (TB, 1)
        # to avoid one masked vst per batch tile (minor; kept for robustness).
        loss_ref[...] = (m_acc[...] + jnp.log(l_acc[...])) - t_acc[...]


def _round_up(x, a):
    return ((x + a - 1) // a) * a


def _hw_targets():
    """Per-generation (TB target, TC target, vmem_limit_bytes, is_v7x)."""
    try:
        kind = jax.devices()[0].device_kind.lower()
    except Exception:
        kind = ""
    if "v5" in kind:
        # v5e: 4x128^2 MXU, ~0.82 TB/s HBM -> TB >= ~240 hits the matmul
        # roofline; 128 MiB physical VMEM so 64 MiB scoped is plenty.
        return 256, 1024, 64 * 1024 * 1024, False
    if "v7" in kind or "7x" in kind:
        # v7x: only 64 MiB VMEM per TC, 2 TCs; TB >= ~310 per-TC for roofline
        # and we force >= 2 batch tiles so both cores get work.
        return 512, 2048, 44 * 1024 * 1024, True
    # v6e / default: need TB >= ~650 @ 1.4 TB/s to be MXU-bound on the weight
    # stream; 128 MiB physical VMEM -> 96 MiB scoped.
    return 1024, 2048, 96 * 1024 * 1024, False


def _fit_tiles(tb, tc, d, mm_bytes, vmem_limit):
    """Shrink (TB, TC) until the working set fits the scoped VMEM budget."""
    def est(tb_, tc_):
        return (2 * tb_ * d * 4            # double-buffered f32 feature tiles
                + tb_ * d * mm_bytes       # cached normalized-feature scratch
                + 2 * d * tc_ * mm_bytes   # double-buffered weight tiles
                + 3 * tb_ * tc_ * 4        # live f32 (TB, TC) temporaries
                + 8 * tb_ * 4)             # accumulators + output
    budget = int(0.75 * vmem_limit)
    # Shrink TC first (keeps the TB-driven arithmetic intensity), then TB.
    while est(tb, tc) > budget and tc > 512:
        tc = max(512, ((tc // 2) // 128) * 128)
    while est(tb, tc) > budget and tb > 64:
        tb = max(64, ((tb // 2) // 8) * 8)
    return tb, tc


def cosface_loss(features, weight, labels, s=30.0, m=0.35,
                 matmul_dtype=jnp.bfloat16):
    """features (B, D) f32, weight (C, D) f32, labels (B,) int -> scalar f32 loss."""
    features = features.astype(jnp.float32)
    weight = weight.astype(jnp.float32)
    B, D = features.shape
    C, D2 = weight.shape
    assert D == D2, (features.shape, weight.shape)

    # Normalize the weight once per call and present it lane-dense as (D, C)
    # so the MXU RHS needs no in-kernel transpose (cheap, memory-bound prep).
    # TODO(synk): when B/TB <= 2 and C is huge, stream raw (TC, D) weight tiles
    # and normalize/cast in-kernel to skip this extra HBM pass over the weight.
    w_inv = lax.rsqrt(jnp.maximum(jnp.sum(weight * weight, axis=1, keepdims=True), _EPS2))
    w_t = (weight * w_inv).T.astype(matmul_dtype)                   # (D, C)

    tb_t, tc_t, vmem_limit, is_v7 = _hw_targets()
    TB = min(tb_t, _round_up(B, 8))
    if is_v7 and B > 8:
        # Keep at least two batch tiles so the "parallel" axis feeds both TCs.
        TB = min(TB, _round_up(-(-B // 2), 8))
    TC = min(tc_t, _round_up(C, 128))
    TB, TC = _fit_tiles(TB, TC, D, jnp.dtype(matmul_dtype).itemsize, vmem_limit)

    # Pad ragged B / C instead of falling back to whole-dim blocks.
    B_pad = _round_up(B, TB)
    C_pad = _round_up(C, TC)
    feats_p = features if B_pad == B else jnp.pad(features, ((0, B_pad - B), (0, 0)))
    labels2d = labels.astype(jnp.int32).reshape(B, 1)
    labels_p = labels2d if B_pad == B else jnp.pad(labels2d, ((0, B_pad - B), (0, 0)))
    w_tp = w_t if C_pad == C else jnp.pad(w_t, ((0, 0), (0, C_pad - C)))

    kernel = functools.partial(_cosface_kernel, s=float(s), m=float(m), tc=TC,
                               c_valid=C, c_pad=C_pad, mm_dtype=matmul_dtype)

    # TODO(synk): for huge C with tiny B on v7x, shard the class axis across
    # the two TCs and combine partial (m, l, t) in a JAX epilogue instead.
    per_example = pl.pallas_call(
        kernel,
        out_shape=jax.ShapeDtypeStruct((B_pad, 1), jnp.float32),
        grid_spec=pltpu.PrefetchScalarGridSpec(
            num_scalar_prefetch=0,
            grid=(B_pad // TB, C_pad // TC),
            in_specs=[
                pl.BlockSpec((TB, D), lambda b, c: (b, 0)),   # features
                pl.BlockSpec((D, TC), lambda b, c: (0, c)),   # normalized weight^T
                pl.BlockSpec((TB, 1), lambda b, c: (b, 0)),   # labels
            ],
            out_specs=pl.BlockSpec((TB, 1), lambda b, c: (b, 0)),
            scratch_shapes=[pltpu.VMEM((TB, 1), jnp.float32)] * 3
                         + [pltpu.VMEM((TB, D), matmul_dtype)],
        ),
        compiler_params=pltpu.CompilerParams(
            dimension_semantics=("parallel", "arbitrary"),
            vmem_limit_bytes=vmem_limit,
        ),
    )(feats_p, w_tp, labels_p)

    # Padded rows are excluded from the mean.
    return jnp.mean(per_example[:B, 0])


def _reference_loss(features, weight, labels, s, m, mm_dtype, fold_s):
    """Plain-JAX reference.  fold_s=True matches the kernel's operand rounding
    (s folded into the mm_dtype feature operand); fold_s=False is torch order."""
    f = features.astype(jnp.float32)
    w = weight.astype(jnp.float32)
    f_n = f * lax.rsqrt(jnp.maximum(jnp.sum(f * f, axis=1, keepdims=True), _EPS2))
    w_n = w * lax.rsqrt(jnp.maximum(jnp.sum(w * w, axis=1, keepdims=True), _EPS2))
    if fold_s:
        s_cos = jnp.dot((f_n * s).astype(mm_dtype), w_n.T.astype(mm_dtype),
                        preferred_element_type=jnp.float32)
    else:
        s_cos = s * jnp.dot(f_n.astype(mm_dtype), w_n.T.astype(mm_dtype),
                            preferred_element_type=jnp.float32)
    one_hot = jax.nn.one_hot(labels, w.shape[0], dtype=jnp.float32)
    logits = s_cos - (s * m) * one_hot
    return jnp.mean(jax.nn.logsumexp(logits, axis=1)
                    - jnp.sum(one_hot * logits, axis=1))


if __name__ == "__main__":
    # Small shapes consistent with the module: batch=8, feature_dim=32, classes=16.
    B, D, C = 8, 32, 16
    s_hp, m_hp = 30.0, 0.35

    key = jax.random.PRNGKey(0)
    k_feat, k_w, k_lab = jax.random.split(key, 3)
    features = jax.random.normal(k_feat, (B, D), dtype=jnp.float32)
    labels = jax.random.randint(k_lab, (B,), 0, C, dtype=jnp.int32)
    # nn.init.xavier_uniform_ on (num_classes, feature_dim): U(-a, a), a = sqrt(6/(C+D)).
    bound = math.sqrt(6.0 / (C + D))
    weight = jax.random.uniform(k_w, (C, D), dtype=jnp.float32,
                                minval=-bound, maxval=bound)

    # f32-operand path: tight check against the torch-order f32 reference
    # (s-folding is exact noise at f32 precision).
    loss_f32 = cosface_loss(features, weight, labels, s=s_hp, m=m_hp,
                            matmul_dtype=jnp.float32)
    jax.block_until_ready(loss_f32)
    ref_f32 = _reference_loss(features, weight, labels, s_hp, m_hp,
                              jnp.float32, fold_s=False)
    assert jnp.allclose(loss_f32, ref_f32, atol=1e-4, rtol=1e-4), (loss_f32, ref_f32)

    # Default bf16-MXU path: check against a reference with matching operand
    # rounding (s folded into the bf16 feature operand, as the kernel does).
    loss_bf16 = cosface_loss(features, weight, labels, s=s_hp, m=m_hp)
    jax.block_until_ready(loss_bf16)
    ref_bf16 = _reference_loss(features, weight, labels, s_hp, m_hp,
                               jnp.bfloat16, fold_s=True)
    assert jnp.allclose(loss_bf16, ref_bf16, atol=2e-2, rtol=2e-2), (loss_bf16, ref_bf16)

    print("KERNEL_OK")
</pallas_src>

<mosaic_0001>
module attributes {stable_mosaic.version = 11 : i64} {
  func.func @_cosface_kernel(%arg0: i32, %arg1: i32, %arg2: memref<8x32xf32, #tpu.memory_space<vmem>>, %arg3: memref<32x128xf32, #tpu.memory_space<vmem>>, %arg4: memref<8x1xi32, #tpu.memory_space<vmem>>, %arg5: memref<8x1xf32, #tpu.memory_space<vmem>>, %arg6: memref<8x1xf32, #tpu.memory_space<vmem>>, %arg7: memref<8x1xf32, #tpu.memory_space<vmem>>, %arg8: memref<8x1xf32, #tpu.memory_space<vmem>>, %arg9: memref<8x32xf32, #tpu.memory_space<vmem>>) attributes {dimension_semantics = [#tpu.dimension_semantics<parallel>, #tpu.dimension_semantics<arbitrary>], iteration_bounds = array<i64: 1, 1>, scalar_prefetch = 0 : i64, scratch_operands = 4 : i64, tpu.core_type = #tpu.core_type<tc>, window_params = [{transform_indices = @transform_0, window_bounds = array<i64: 8, 32>}, {transform_indices = @transform_1, window_bounds = array<i64: 32, 128>}, {transform_indices = @transform_2, window_bounds = array<i64: 8, 1>}, {transform_indices = @transform_3, window_bounds = array<i64: 8, 1>}]} {
    %c0_i32 = arith.constant 0 : i32
    %0 = arith.cmpi eq, %arg1, %c0_i32 : i32
    %1 = arith.extui %0 : i1 to i32
    %c0_i32_0 = arith.constant 0 : i32
    %2 = arith.cmpi ne, %1, %c0_i32_0 : i32
    scf.if %2 {
      %cst_30 = arith.constant 0xFF800000 : f32
      %50 = vector.broadcast %cst_30 : f32 to vector<8x1xf32>
      %c0_31 = arith.constant 0 : index
      %c0_32 = arith.constant 0 : index
      %51 = vector.load %arg6[%c0_31, %c0_32] : memref<8x1xf32, #tpu.memory_space<vmem>>, vector<8x1xf32>
      tpu.vector_store %arg6[%c0_31, %c0_32], %50 {strides = array<i32>} : memref<8x1xf32, #tpu.memory_space<vmem>>, vector<8x1xf32>,
      %cst_33 = arith.constant 0.000000e+00 : f32
      %52 = vector.broadcast %cst_33 : f32 to vector<8x1xf32>
      %c0_34 = arith.constant 0 : index
      %c0_35 = arith.constant 0 : index
      %53 = vector.load %arg7[%c0_34, %c0_35] : memref<8x1xf32, #tpu.memory_space<vmem>>, vector<8x1xf32>
      tpu.vector_store %arg7[%c0_34, %c0_35], %52 {strides = array<i32>} : memref<8x1xf32, #tpu.memory_space<vmem>>, vector<8x1xf32>,
      %cst_36 = arith.constant 0.000000e+00 : f32
      %54 = vector.broadcast %cst_36 : f32 to vector<8x1xf32>
      %c0_37 = arith.constant 0 : index
      %c0_38 = arith.constant 0 : index
      %55 = vector.load %arg8[%c0_37, %c0_38] : memref<8x1xf32, #tpu.memory_space<vmem>>, vector<8x1xf32>
      tpu.vector_store %arg8[%c0_37, %c0_38], %54 {strides = array<i32>} : memref<8x1xf32, #tpu.memory_space<vmem>>, vector<8x1xf32>,
      %c0_39 = arith.constant 0 : index
      %c0_40 = arith.constant 0 : index
      %56 = vector.load %arg2[%c0_39, %c0_40] : memref<8x32xf32, #tpu.memory_space<vmem>>, vector<8x32xf32>
      %57 = arith.mulf %56, %56 : vector<8x32xf32>
      %cst_41 = arith.constant dense<0.000000e+00> : vector<8xf32>
      %58 = vector.multi_reduction <add>, %57, %cst_41 [1] : vector<8x32xf32> to vector<8xf32>
      %59 = vector.shape_cast %58 : vector<8xf32> to vector<8x1xf32>
      %cst_42 = arith.constant 1.000000e-24 : f32
      %60 = vector.broadcast %cst_42 : f32 to vector<8x1xf32>
      %61 = arith.maximumf %59, %60 : vector<8x1xf32>
      %62 = math.rsqrt %61 : vector<8x1xf32>
      %cst_43 = arith.constant 3.000000e+01 : f32
      %63 = vector.broadcast %cst_43 : f32 to vector<8x1xf32>
      %64 = arith.mulf %62, %63 : vector<8x1xf32>
      %65 = vector.broadcast %64 : vector<8x1xf32> to vector<8x32xf32>
      %66 = arith.mulf %56, %65 : vector<8x32xf32>
      %c0_44 = arith.constant 0 : index
      %c0_45 = arith.constant 0 : index
      %67 = vector.load %arg9[%c0_44, %c0_45] : memref<8x32xf32, #tpu.memory_space<vmem>>, vector<8x32xf32>
      tpu.vector_store %arg9[%c0_44, %c0_45], %66 {strides = array<i32>} : memref<8x32xf32, #tpu.memory_space<vmem>>, vector<8x32xf32>,
    } else {
    }
    %c0 = arith.constant 0 : index
    %c0_1 = arith.constant 0 : index
    %3 = vector.load %arg9[%c0, %c0_1] : memref<8x32xf32, #tpu.memory_space<vmem>>, vector<8x32xf32>
    %c0_2 = arith.constant 0 : index
    %c0_3 = arith.constant 0 : index
    %4 = vector.load %arg3[%c0_2, %c0_3] : memref<32x128xf32, #tpu.memory_space<vmem>>, vector<32x128xf32>
    %cst = arith.constant dense<0.000000e+00> : vector<8x128xf32>
    %5 = tpu.matmul %3, %4, %cst {dimension_numbers = #tpu.dot_dimension_numbers<[1], [0], [0], [1], [0, 0, 1, 1], [], []>} : vector<8x32xf32>, vector<32x128xf32>, vector<8x128xf32> -> vector<8x128xf32>
    %6 = tpu.iota {dimensions = array<i32: 1>} : vector<8x128xi32>
    %c0_4 = arith.constant 0 : index
    %c0_5 = arith.constant 0 : index
    %7 = vector.load %arg4[%c0_4, %c0_5] : memref<8x1xi32, #tpu.memory_space<vmem>>, vector<8x1xi32>
    %c128_i32 = arith.constant 128 : i32
    %8 = arith.muli %arg1, %c128_i32 : i32
    %9 = vector.broadcast %8 : i32 to vector<8x1xi32>
    %10 = arith.subi %7, %9 : vector<8x1xi32>
    %11 = vector.broadcast %10 : vector<8x1xi32> to vector<8x128xi32>
    %12 = arith.cmpi eq, %6, %11 : vector<8x128xi32>
    %cst_6 = arith.constant 1.050000e+01 : f32
    %cst_7 = arith.constant 0.000000e+00 : f32
    %13 = vector.broadcast %cst_6 : f32 to vector<8x128xf32>
    %14 = vector.broadcast %cst_7 : f32 to vector<8x128xf32>
    %15 = arith.select %12, %13, %14 : vector<8x128xi1>, vector<8x128xf32>
    %16 = arith.subf %5, %15 : vector<8x128xf32>
    %c128_i32_8 = arith.constant 128 : i32
    %17 = arith.muli %arg1, %c128_i32_8 : i32
    %c16_i32 = arith.constant 16 : i32
    %18 = arith.subi %c16_i32, %17 : i32
    %19 = vector.broadcast %18 : i32 to vector<8x128xi32>
    %20 = arith.cmpi slt, %6, %19 : vector<8x128xi32>
    %cst_9 = arith.constant 0xFF800000 : f32
    %21 = vector.broadcast %cst_9 : f32 to vector<8x128xf32>
    %22 = arith.select %20, %16, %21 : vector<8x128xi1>, vector<8x128xf32>
    %cst_10 = arith.constant dense<0xFF800000> : vector<8xf32>
    %23 = vector.multi_reduction <maximumf>, %22, %cst_10 [1] : vector<8x128xf32> to vector<8xf32>
    %24 = vector.shape_cast %23 : vector<8xf32> to vector<8x1xf32>
    %c0_11 = arith.constant 0 : index
    %c0_12 = arith.constant 0 : index
    %25 = vector.load %arg6[%c0_11, %c0_12] : memref<8x1xf32, #tpu.memory_space<vmem>>, vector<8x1xf32>
    %26 = arith.maximumf %25, %24 : vector<8x1xf32>
    %c0_13 = arith.constant 0 : index
    %c0_14 = arith.constant 0 : index
    %27 = vector.load %arg6[%c0_13, %c0_14] : memref<8x1xf32, #tpu.memory_space<vmem>>, vector<8x1xf32>
    %28 = arith.subf %27, %26 : vector<8x1xf32>
    %29 = math.exp %28 : vector<8x1xf32>
    %c0_15 = arith.constant 0 : index
    %c0_16 = arith.constant 0 : index
    %30 = vector.load %arg7[%c0_15, %c0_16] : memref<8x1xf32, #tpu.memory_space<vmem>>, vector<8x1xf32>
    %31 = arith.mulf %29, %30 : vector<8x1xf32>
    %32 = vector.broadcast %26 : vector<8x1xf32> to vector<8x128xf32>
    %33 = arith.subf %22, %32 : vector<8x128xf32>
    %34 = math.exp %33 : vector<8x128xf32>
    %cst_17 = arith.constant dense<0.000000e+00> : vector<8xf32>
    %35 = vector.multi_reduction <add>, %34, %cst_17 [1] : vector<8x128xf32> to vector<8xf32>
    %36 = vector.shape_cast %35 : vector<8xf32> to vector<8x1xf32>
    %37 = arith.addf %31, %36 : vector<8x1xf32>
    %c0_18 = arith.constant 0 : index
    %c0_19 = arith.constant 0 : index
    %38 = vector.load %arg7[%c0_18, %c0_19] : memref<8x1xf32, #tpu.memory_space<vmem>>, vector<8x1xf32>
    tpu.vector_store %arg7[%c0_18, %c0_19], %37 {strides = array<i32>} : memref<8x1xf32, #tpu.memory_space<vmem>>, vector<8x1xf32>,
    %c0_20 = arith.constant 0 : index
    %c0_21 = arith.constant 0 : index
    %39 = vector.load %arg8[%c0_20, %c0_21] : memref<8x1xf32, #tpu.memory_space<vmem>>, vector<8x1xf32>
    %cst_22 = arith.constant 0.000000e+00 : f32
    %40 = vector.broadcast %cst_22 : f32 to vector<8x128xf32>
    %41 = arith.select %12, %22, %40 : vector<8x128xi1>, vector<8x128xf32>
    %cst_23 = arith.constant dense<0.000000e+00> : vector<8xf32>
    %42 = vector.multi_reduction <add>, %41, %cst_23 [1] : vector<8x128xf32> to vector<8xf32>
    %43 = vector.shape_cast %42 : vector<8xf32> to vector<8x1xf32>
    %44 = arith.addf %39, %43 : vector<8x1xf32>
    %c0_24 = arith.constant 0 : index
    %c0_25 = arith.constant 0 : index
    %45 = vector.load %arg8[%c0_24, %c0_25] : memref<8x1xf32, #tpu.memory_space<vmem>>, vector<8x1xf32>
    tpu.vector_store %arg8[%c0_24, %c0_25], %44 {strides = array<i32>} : memref<8x1xf32, #tpu.memory_space<vmem>>, vector<8x1xf32>,
    %c0_26 = arith.constant 0 : index
    %c0_27 = arith.constant 0 : index
    %46 = vector.load %arg6[%c0_26, %c0_27] : memref<8x1xf32, #tpu.memory_space<vmem>>, vector<8x1xf32>
    tpu.vector_store %arg6[%c0_26, %c0_27], %26 {strides = array<i32>} : memref<8x1xf32, #tpu.memory_space<vmem>>, vector<8x1xf32>,
    %c0_i32_28 = arith.constant 0 : i32
    %47 = arith.cmpi eq, %arg1, %c0_i32_28 : i32
    %48 = arith.extui %47 : i1 to i32
    %c0_i32_29 = arith.constant 0 : i32
    %49 = arith.cmpi ne, %48, %c0_i32_29 : i32
    scf.if %49 {
      %c0_30 = arith.constant 0 : index
      %c0_31 = arith.constant 0 : index
      %50 = vector.load %arg6[%c0_30, %c0_31] : memref<8x1xf32, #tpu.memory_space<vmem>>, vector<8x1xf32>
      %c0_32 = arith.constant 0 : index
      %c0_33 = arith.constant 0 : index
      %51 = vector.load %arg7[%c0_32, %c0_33] : memref<8x1xf32, #tpu.memory_space<vmem>>, vector<8x1xf32>
      %52 = math.log %51 : vector<8x1xf32>
      %53 = arith.addf %50, %52 : vector<8x1xf32>
      %c0_34 = arith.constant 0 : index
      %c0_35 = arith.constant 0 : index
      %54 = vector.load %arg8[%c0_34, %c0_35] : memref<8x1xf32, #tpu.memory_space<vmem>>, vector<8x1xf32>
      %55 = arith.subf %53, %54 : vector<8x1xf32>
      %c0_36 = arith.constant 0 : index
      %c0_37 = arith.constant 0 : index
      %56 = vector.load %arg5[%c0_36, %c0_37] : memref<8x1xf32, #tpu.memory_space<vmem>>, vector<8x1xf32>
      tpu.vector_store %arg5[%c0_36, %c0_37], %55 {strides = array<i32>} : memref<8x1xf32, #tpu.memory_space<vmem>>, vector<8x1xf32>,
    } else {
    }
    return
  }
  func.func @transform_0(%arg0: i32, %arg1: i32) -> (i32, i32) {
    %c0_i32 = arith.constant 0 : i32
    %c0_i32_0 = arith.constant 0 : i32
    return %arg0, %c0_i32 : i32, i32
  }
  func.func @transform_1(%arg0: i32, %arg1: i32) -> (i32, i32) {
    %c0_i32 = arith.constant 0 : i32
    %c0_i32_0 = arith.constant 0 : i32
    return %c0_i32, %arg1 : i32, i32
  }
  func.func @transform_2(%arg0: i32, %arg1: i32) -> (i32, i32) {
    %c0_i32 = arith.constant 0 : i32
    %c0_i32_0 = arith.constant 0 : i32
    return %arg0, %c0_i32 : i32, i32
  }
  func.func @transform_3(%arg0: i32, %arg1: i32) -> (i32, i32) {
    %c0_i32 = arith.constant 0 : i32
    %c0_i32_0 = arith.constant 0 : i32
    return %arg0, %c0_i32 : i32, i32
  }
}

</mosaic_0001>

<bundles_post_ra>
// kernel: tpu_custom_call.1
= control target key start
LH: loop header
LB: loop body
LE: loop exit
PB: predicated region body
PF: predicated region fallthrough
CT: control target
= control target key end

     0   :  { %8 = vsyncpa [#allocation7], 0  ;;  %s449_s0 = inlined_call_operand.hbm [shape: f32[8,32], index: 0, kind: input, shape index: {}]   ;;  %s450_s1 = inlined_call_operand.hbm [shape: f32[32,128], index: 1, kind: input, shape index: {}]   ;;  %s451_s2 = inlined_call_operand.hbm [shape: s32[8,1], index: 2, kind: input, shape index: {}]   ;;  %s452_s3 = inlined_call_operand.hbm [shape: f32[8,1], index: 3, kind: output, shape index: {}]  }
   0x1   :  { %9 = vsyncpa [#allocation10], 0 }
   0x2   :  { %10 = vsyncpa [#allocation8], 0  ;;  %s360_s12 = smov [#allocation9]   ;;  %s266_s16 = scalar_lea.hbm %s450_s1, 512 }
   0x3   :  { %s26_s13 = sshll.u32 %s360_s12, 4  ;;  %p267_p0 = scmp.ne.s32.totalorder %s450_s1, %s266_s16  ;;  %s27_s13 = int_to_ptr.vmem [resolvable:$true] %s26_s13 }
   0x4   :  { %p270_p1 = scmp.lt.u32.totalorder %s266_s16, %s450_s1 }
   0x6   :  { %p272_p2 = pnand %p270_p1, %p267_p0 }
   0x8   :  { %275 = shalt.err (!%p272_p2)
}
   0x9   :  { %s276_s21 = scalar_lea.vmem %s27_s13, 512  ;;  %p281_p4 = scmp.lt.s32.totalorder %s27_s13, %s27_s13 }
   0xa   :  { %p277_p3 = scmp.ne.s32.totalorder %s27_s13, %s276_s21  ;;  %p282_p5 = scmp.lt.s32.totalorder %s276_s21, %s276_s21 }
   0xc   :  { %p283_p6 = por %p282_p5, %p281_p4 }
   0xe   :  { %p284_p7 = pnand %p283_p6, %p277_p3 }
  0x10   :  { %287 = shalt.err (!%p284_p7)
}
  0x11   :  { %s361_s22 = smov 128   ;;  %s362_s23 = smov 8  }
  0x12   :  { %32 = dma.hbm_to_vmem [thread:$0]  %s450_s1, 512, %s27_s13, [#allocation10], %s361_s22, %s361_s22, %s362_s23  }
  0x13   :  { %s363_s26 = smov [#allocation6]   ;;  %s364_s28 = smov [#allocation11]  }
  0x14   :  { %s17_s27 = sshll.u32 %s363_s26, 4  ;;  %s39_s29 = sshll.u32 %s364_s28, 4  ;;  %s18_s27 = int_to_ptr.vmem [resolvable:$true] %s17_s27  ;;  %s40_s29 = int_to_ptr.vmem [resolvable:$true] %s39_s29 }
  0x15   :  { %s288_s5 = scalar_lea.hbm %s449_s0, 128 }
  0x16   :  { %p289_p8 = scmp.ne.s32.totalorder %s449_s0, %s288_s5  ;;  %p292_p9 = scmp.lt.u32.totalorder %s288_s5, %s449_s0 }
  0x18   :  { %p294_p10 = pnand %p292_p9, %p289_p8 }
  0x1a   :  { %297 = shalt.err (!%p294_p10)
}
  0x1b   :  { %s298_s1 = scalar_lea.vmem %s18_s27, 128  ;;  %p303_p12 = scmp.lt.s32.totalorder %s18_s27, %s18_s27 }
  0x1c   :  { %p299_p11 = scmp.ne.s32.totalorder %s18_s27, %s298_s1  ;;  %p304_p13 = scmp.lt.s32.totalorder %s298_s1, %s298_s1 }
  0x1e   :  { %p305_p0 = por %p304_p13, %p303_p12 }
  0x20   :  { %p306_p1 = pnand %p305_p0, %p299_p11 }
  0x22   :  { %309 = shalt.err (!%p306_p1)
}
  0x23   :  { %20 = dma.hbm_to_vmem [thread:$0]  %s449_s0, 128, %s18_s27, [#allocation7]  }
  0x24   :  { %s310_s14 = scalar_lea.hbm %s451_s2, 128 }
  0x25   :  { %p311_p2 = scmp.ne.s32.totalorder %s451_s2, %s310_s14  ;;  %p314_p3 = scmp.lt.u32.totalorder %s310_s14, %s451_s2 }
  0x27   :  { %p316_p4 = pnand %p314_p3, %p311_p2 }
  0x29   :  { %319 = shalt.err (!%p316_p4)
}
  0x2a   :  { %s320_s19 = scalar_lea.vmem %s40_s29, 128  ;;  %p325_p6 = scmp.lt.s32.totalorder %s40_s29, %s40_s29 }
  0x2b   :  { %p321_p5 = scmp.ne.s32.totalorder %s40_s29, %s320_s19  ;;  %p326_p7 = scmp.lt.s32.totalorder %s320_s19, %s320_s19 }
  0x2d   :  { %p327_p8 = por %p326_p7, %p325_p6 }
  0x2f   :  { %p328_p9 = pnand %p327_p8, %p321_p5 }
  0x31   :  { %331 = shalt.err (!%p328_p9)
}
  0x32   :  { %42 = dma.hbm_to_vmem [thread:$0]  %s451_s2, 128, %s40_s29, [#allocation10]  }
  0x33   :  { %354 = dma.done.wait [#allocation7], 128  }
  0x34   :  { %355 = vsyncadd [#allocation7], 4294967168 }
  0x35   :  { %356 = dma.done.wait [#allocation10], 640  }
  0x36   :  { %357 = vsyncadd [#allocation10], 4294966656  ;;  %v60_v0 = vld [vmem:[#allocation6] sm:$0xff]  ;;  %vm62_vm0 = vcmask 261120   ;;  %v72_v3 = vld [vmem:[#allocation9] sm:$0xff]  ;;  %v365_v6 = vmov 0.0|0.0   ;;  %v150_v20 = vlaneseq }
  0x37   :  { %v61_v1 = vmul.f32 %v60_v0, %v60_v0  ;;  %v73_v4 = vld [vmem:[#allocation9 + $0x8] sm:$0xff]  ;;  %239 = vmatprep.subr.bf16.mxu0 %v365_v6  ;;  %v74_v7 = vld [vmem:[#allocation9 + $0x10] sm:$0xff]  ;;  %v75_v8 = vld [vmem:[#allocation9 + $0x18] sm:$0xff]  ;;  %vm56_vm1 = vcmask 7168   ;;  %v366_v10 = vmov 0.0   ;;  %vm367_vm2 = vmmov 0  }
  0x38   :  { %v240_v5 = vpack.c.bf16 %v73_v4, %v72_v3  ;;  %v243_v9 = vpack.c.bf16 %v75_v8, %v74_v7  ;;  %58 = vst.msk [vmem:[#allocation3] sm:$0xff] %vm56_vm1, %v366_v10  ;;  %59 = vst.msk [vmem:[#allocation4] sm:$0xff] %vm56_vm1, %v366_v10  ;;  %236 = vmatprep.mubr.msk.f32.mxu0 %vm367_vm2, %v366_v10  ;;  %v152_v11 = vld [vmem:[#allocation11] sm:$0xff]  ;;  %v368_v12 = vmov 0   ;;  %v369_v19 = vmov -inf   ;;  %s370_s2 = smov [#allocation12]  }
  0x39   :  { %v63_v2 = vsel %vm62_vm0, %v61_v1, 0.0  ;;  %256 = vset.pattern.permute.xlu0 %v368_v12  ;;  %257 = vset.pattern.permute.xlu1 %v368_v12  ;;  %57 = vst.msk [vmem:[#allocation2] sm:$0xff] %vm56_vm1, %v369_v19  ;;  %v151_v21 = vand.u32 127, %v150_v20  ;;  %s212_s21 = sshll.u32 %s370_s2, 4  ;;  %s213_s21 = int_to_ptr.vmem [resolvable:$true] %s212_s21 }
  0x3a   :  { %64 = vadd.xlane.f32.xlu0 %v63_v2  ;;  %241 = vmatpush3.bf16.msra.mxu0 %v240_v5  ;;  %s332_s22 = scalar_lea.vmem %s213_s21, 128  ;;  %p337_p11 = scmp.lt.s32.totalorder %s213_s21, %s213_s21 }
  0x3b   :  { %242 = vmatprep.subr.bf16.mxu0 %v365_v6  ;;  %vm164_vm4 = vcmp.lt.s32.totalorder %v151_v21, 16  ;;  %p333_p10 = scmp.ne.s32.totalorder %s213_s21, %s332_s22  ;;  %p338_p12 = scmp.lt.s32.totalorder %s332_s22, %s332_s22 }
  0x3d   :  { %p339_p13 = por %p338_p12, %p337_p11 }
  0x3e   :  { %244 = vmatpush3.bf16.msra.mxu0 %v243_v9 }
  0x3f   :  { %v188_v30 = vld [vmem:[#allocation4] sm:$0xff]  ;;  %v173_v42 = vld [vmem:[#allocation3] sm:$0xff]  ;;  %p340_p0 = pnand %p339_p13, %p333_p10 }
  0x40   :  { %v168_v29 = vld [vmem:[#allocation2] sm:$0xff] }
  0x50   :  { %157 = vperm.xlu0 %256, %v152_v11  }
  0xc7   :  { %v65_v13 = vpop.xlane.xlu0 %64 }
  0xc8   :  { %v66_v14 = vmax.f32 %v65_v13, 1e-24 }
  0xca   :  { %258 = vrsqrt.f32 %v66_v14 }
  0xcf   :  { %v158_v22 = vpop.permute.xlu0 %157 }
  0xd0   :  { %vm159_vm3 = vcmp.eq.s32.totalorder %v151_v21, %v158_v22 }
  0xd1   :  { %v160_v23 = vsel %vm159_vm3, 10.5, %v366_v10 }
  0xd4   :  { %v259_v15 = vpop.eup %258 }
  0xd5   :  { %v68_v16 = vmul.f32 30.0, %v259_v15 }
  0xd7   :  { %v69_v17 = vmul.f32 %v68_v16, %v60_v0 }
  0xd9   :  { %70 = vst.msk [vmem:[#allocation5] sm:$0xff] %vm62_vm0, %v69_v17 }
  0xe0   :  { %v71_v18 = vld [vmem:[#allocation5] sm:$0xff] }
  0xe1   :  { %237 = vmatmul.mubr.msk.f32.vlgmr.msra.gmra.mrb[0].mxu0 %vm62_vm0, %v71_v18 }
 0x1b4   :  { %v146_v24 = vpop.f32.mrb[0].mxu0 }
 0x1b5   :  { %v161_v25 = vsub.f32 %v146_v24, %v160_v23  ;;  %v238_v26 = vpop.f32.mrb[1].mxu0 }
 0x1b7   :  { %v165_v27 = vsel %vm164_vm4, %v161_v25, -inf }
 0x1b8   :  { %166 = vmax.xlane.f32.xlu1 %v165_v27  ;;  %v189_v28 = vsel %vm159_vm3, %v165_v27, 0.0 }
 0x1b9   :  { %190 = vadd.xlane.f32.xlu0 %v189_v28 }
 0x245   :  { %v167_v31 = vpop.xlane.xlu1 %166 }
 0x246   :  { %v169_v32 = vmax.f32 %v168_v29, %v167_v31  ;;  %v191_v33 = vpop.xlane.xlu0 %190 }
 0x247   :  { %v192_v34 = vadd.f32 %v191_v33, %v188_v30 }
 0x248   :  { %v170_v35 = vsub.f32 %v168_v29, %v169_v32  ;;  %194 = vst.msk [vmem:[#allocation2] sm:$0xff] %vm56_vm1, %v169_v32  ;;  %177 = vperm.xlu1 %257, %v169_v32  }
 0x249   :  { %193 = vst.msk [vmem:[#allocation4] sm:$0xff] %vm56_vm1, %v192_v34 }
 0x24a   :  { %v171_v40 = vmul.f32 1.442695, %v170_v35 }
 0x24f   :  { %v198_v49 = vld [vmem:[#allocation2] sm:$0xff] }
 0x250   :  { %v203_v51 = vld [vmem:[#allocation4] sm:$0xff] }
 0x2c7   :  { %v178_v36 = vpop.permute.xlu1 %177 }
 0x2c8   :  { %v180_v37 = vsub.f32 %v165_v27, %v178_v36 }
 0x2ca   :  { %v181_v38 = vmul.f32 1.442695, %v180_v37 }
 0x2cc   :  { %260 = vpow2.f32 %v181_v38 }
 0x2cd   :  { %262 = vpow2.f32 %v171_v40 }
 0x2d6   :  { %v261_v39 = vpop.eup %260 }
 0x2d7   :  { %183 = vadd.xlane.f32.xlu1 %v261_v39  ;;  %v263_v41 = vpop.eup %262 }
 0x2d8   :  { %v174_v43 = vmul.f32 %v263_v41, %v173_v42 }
 0x364   :  { %v184_v44 = vpop.xlane.xlu1 %183 }
 0x365   :  { %v185_v45 = vadd.f32 %v184_v44, %v174_v43 }
 0x367   :  { %187 = vst.msk [vmem:[#allocation3] sm:$0xff] %vm56_vm1, %v185_v45 }
 0x36e   :  { %v199_v46 = vld [vmem:[#allocation3] sm:$0xff] }
 0x36f   :  { %264 = vlog2.f32 %v199_v46 }
 0x379   :  { %v265_v47 = vpop.eup %264 }
 0x37a   :  { %v201_v48 = vmul.f32 0.6931472, %v265_v47 }
 0x37c   :  { %v202_v50 = vadd.f32 %v201_v48, %v198_v49 }
 0x37e   :  { %v204_v52 = vsub.f32 %v202_v50, %v203_v51 }
 0x380   :  { %205 = vst.msk [vmem:[#allocation12] sm:$0xff] %vm56_vm1, %v204_v52 }
 0x381   :  { %343 = shalt.err (!%p340_p0)
}
 0x382   :  { %s344_s25 = scalar_lea.hbm %s452_s3, 128 }
 0x383   :  { %p345_p1 = scmp.ne.s32.totalorder %s452_s3, %s344_s25  ;;  %p348_p2 = scmp.lt.u32.totalorder %s344_s25, %s452_s3 }
 0x385   :  { %p350_p3 = pnand %p348_p2, %p345_p1 }
 0x387   :  { %353 = shalt.err (!%p350_p3)
}
 0x388   :  { %215 = dma.vmem_to_hbm [thread:$0]  %s213_s21, 128, %s452_s3, [#allocation8]  }
 0x389   :  { %358 = dma.done.wait [#allocation8], 128  }
 0x38a   :  { %359 = vsyncadd [#allocation8], 4294967168 }
 0x38b   :  { %219 = vsyncpa [#allocation7], 1 }
 0x38c   :  { %220 = vsyncpa [#allocation10], 1 }
 0x38d   :  { %221 = vsyncpa [#allocation8], 1 }

</bundles_post_ra>
